<compile_context>
chip_gen: v7x
topology: tpu7x:2x2x1
jax: 0.10.0
libtpu: 0.0.40
codegen_flags: <defaults>
</compile_context>

<pallas_src>
import jax
import jax.numpy as jnp
from jax.experimental import pallas as pl
from jax.experimental.pallas import tpu as pltpu


def _round_up(x, m):
    return ((x + m - 1) // m) * m


def _mlp_kernel(s_ref, a_ref, w1s_ref, w1a_ref, b1_ref,
                w2_ref, b2_ref, w3_ref, b3_ref, o_ref):
    # Layer 1 with fused concat:  [s, a] @ W1 == s @ W1[:S] + a @ W1[S:]
    h = (jnp.dot(s_ref[...], w1s_ref[...], preferred_element_type=jnp.float32)
         + jnp.dot(a_ref[...], w1a_ref[...], preferred_element_type=jnp.float32)
         + b1_ref[...])
    h = jnp.maximum(h, 0.0)
    # Layer 2
    h = jnp.dot(h, w2_ref[...], preferred_element_type=jnp.float32) + b2_ref[...]
    h = jnp.maximum(h, 0.0)
    # Layer 3 (output dim padded to a multiple of 128 -> lane-dense store)
    o_ref[...] = (jnp.dot(h, w3_ref[...], preferred_element_type=jnp.float32)
                  + b3_ref[...]).astype(o_ref.dtype)


def dynamics_model_forward(state, action, params, *, batch_tile=256):
    """state: (B, 1, S), action: (B, 1, A) -> (B, S)."""
    w1, b1, w2, b2, w3, b3 = params

    # Squeeze is pure layout plumbing (free in XLA); the concat is fused into
    # the kernel by splitting W1 by rows.
    s = state[:, 0, :]          # (B, S)
    a = action[:, 0, :]         # (B, A)
    B, S = s.shape
    A = a.shape[1]
    H = w1.shape[1]
    S_out = w3.shape[1]

    w1s = w1[:S, :]             # (S, H)
    w1a = w1[S:, :]             # (A, H)

    # Lane-dense output: pad final output feature dim up to a multiple of 128.
    S_pad = _round_up(S_out, 128)
    if S_pad != S_out:
        w3p = jnp.pad(w3, ((0, 0), (0, S_pad - S_out)))
        b3p = jnp.pad(b3, ((0, 0), (0, S_pad - S_out)))
    else:
        w3p, b3p = w3, b3

    # Batch tiling: 256 rows keeps resident weights + double-buffered tiles
    # well under v5e's 16 MiB scoped-VMEM default even at H=1024 f32.
    TM = min(B, batch_tile)
    grid = (pl.cdiv(B, TM),)

    tiled = lambda shape: pl.BlockSpec(shape, lambda i: (i, 0))        # batch-tiled
    resident = lambda shape: pl.BlockSpec(shape, lambda i: (0, 0))     # VMEM-resident

    flops = 2 * B * (S * H + A * H + H * H + H * S_pad)
    bytes_accessed = 4 * (B * (S + A) + B * S_pad
                          + (S + A) * H + H * H + H * S_pad + 2 * H + S_pad)

    out = pl.pallas_call(
        _mlp_kernel,
        out_shape=jax.ShapeDtypeStruct((B, S_pad), jnp.float32),
        grid=grid,
        in_specs=[
            tiled((TM, S)),            # state tile
            tiled((TM, A)),            # action tile
            resident(w1s.shape), resident(w1a.shape), resident(b1.shape),
            resident(w2.shape), resident(b2.shape),
            resident(w3p.shape), resident(b3p.shape),
        ],
        out_specs=tiled((TM, S_pad)),
        compiler_params=pltpu.CompilerParams(
            dimension_semantics=("parallel",)),
        cost_estimate=pl.CostEstimate(
            flops=flops, transcendentals=0, bytes_accessed=bytes_accessed),
    )(s, a, w1s, w1a, b1, w2, b2, w3p, b3p)

    return out[:, :S_out]


def init_params(key, state_dim, action_dim, hidden_dim):
    """Deterministic init mimicking nn.Linear default (uniform +/- 1/sqrt(fan_in)).
    Weights are (in, out)."""
    dims = [(state_dim + action_dim, hidden_dim),
            (hidden_dim, hidden_dim),
            (hidden_dim, state_dim)]
    params = []
    for (fan_in, fan_out) in dims:
        key, kw, kb = jax.random.split(key, 3)
        bound = 1.0 / jnp.sqrt(fan_in)
        w = jax.random.uniform(kw, (fan_in, fan_out), jnp.float32, -bound, bound)
        b = jax.random.uniform(kb, (1, fan_out), jnp.float32, -bound, bound)
        params += [w, b]
    return tuple(params)


def reference_forward(state, action, params):
    w1, b1, w2, b2, w3, b3 = params
    x = jnp.concatenate([state[:, 0, :], action[:, 0, :]], axis=1)
    h = jnp.maximum(x @ w1 + b1, 0.0)
    h = jnp.maximum(h @ w2 + b2, 0.0)
    return h @ w3 + b3


if __name__ == "__main__":
    B, S, A, H = 8, 16, 8, 32  # small demo shapes (module default hidden_dim=1024)

    key = jax.random.PRNGKey(0)
    kp, ks, ka = jax.random.split(key, 3)
    params = init_params(kp, S, A, H)

    state = jax.random.normal(ks, (B, 1, S), jnp.float32)
    action = jax.random.normal(ka, (B, 1, A), jnp.float32)

    out = dynamics_model_forward(state, action, params)
    out = jax.block_until_ready(out)

    ref = reference_forward(state, action, params)
    assert out.shape == (B, S)
    assert jnp.allclose(out, ref, atol=1e-4, rtol=1e-4)

    print("KERNEL_OK")
</pallas_src>

<mosaic_0001>
module attributes {stable_mosaic.version = 11 : i64} {
  func.func @_mlp_kernel(%arg0: i32, %arg1: memref<8x16xf32, #tpu.memory_space<vmem>>, %arg2: memref<8x8xf32, #tpu.memory_space<vmem>>, %arg3: memref<16x32xf32, #tpu.memory_space<vmem>>, %arg4: memref<8x32xf32, #tpu.memory_space<vmem>>, %arg5: memref<1x32xf32, #tpu.memory_space<vmem>>, %arg6: memref<32x32xf32, #tpu.memory_space<vmem>>, %arg7: memref<1x32xf32, #tpu.memory_space<vmem>>, %arg8: memref<32x128xf32, #tpu.memory_space<vmem>>, %arg9: memref<1x128xf32, #tpu.memory_space<vmem>>, %arg10: memref<8x128xf32, #tpu.memory_space<vmem>>) attributes {dimension_semantics = [#tpu.dimension_semantics<parallel>], iteration_bounds = array<i64: 1>, scalar_prefetch = 0 : i64, scratch_operands = 0 : i64, tpu.core_type = #tpu.core_type<tc>, window_params = [{transform_indices = @transform_0, window_bounds = array<i64: 8, 16>}, {transform_indices = @transform_1, window_bounds = array<i64: 8, 8>}, {pipeline_mode = #tpu.pipeline_mode<synchronous>, transform_indices = @transform_2, window_bounds = array<i64: 16, 32>}, {pipeline_mode = #tpu.pipeline_mode<synchronous>, transform_indices = @transform_3, window_bounds = array<i64: 8, 32>}, {pipeline_mode = #tpu.pipeline_mode<synchronous>, transform_indices = @transform_4, window_bounds = array<i64: 1, 32>}, {pipeline_mode = #tpu.pipeline_mode<synchronous>, transform_indices = @transform_5, window_bounds = array<i64: 32, 32>}, {pipeline_mode = #tpu.pipeline_mode<synchronous>, transform_indices = @transform_6, window_bounds = array<i64: 1, 32>}, {pipeline_mode = #tpu.pipeline_mode<synchronous>, transform_indices = @transform_7, window_bounds = array<i64: 32, 128>}, {pipeline_mode = #tpu.pipeline_mode<synchronous>, transform_indices = @transform_8, window_bounds = array<i64: 1, 128>}, {transform_indices = @transform_9, window_bounds = array<i64: 8, 128>}]} {
    %c0 = arith.constant 0 : index
    %c0_0 = arith.constant 0 : index
    %0 = vector.load %arg1[%c0, %c0_0] : memref<8x16xf32, #tpu.memory_space<vmem>>, vector<8x16xf32>
    %c0_1 = arith.constant 0 : index
    %c0_2 = arith.constant 0 : index
    %1 = vector.load %arg3[%c0_1, %c0_2] : memref<16x32xf32, #tpu.memory_space<vmem>>, vector<16x32xf32>
    %cst = arith.constant dense<0.000000e+00> : vector<8x32xf32>
    %2 = tpu.matmul %0, %1, %cst {dimension_numbers = #tpu.dot_dimension_numbers<[1], [0], [0], [1], [0, 0, 1, 1], [], []>} : vector<8x16xf32>, vector<16x32xf32>, vector<8x32xf32> -> vector<8x32xf32>
    %c0_3 = arith.constant 0 : index
    %c0_4 = arith.constant 0 : index
    %3 = vector.load %arg2[%c0_3, %c0_4] : memref<8x8xf32, #tpu.memory_space<vmem>>, vector<8x8xf32>
    %c0_5 = arith.constant 0 : index
    %c0_6 = arith.constant 0 : index
    %4 = vector.load %arg4[%c0_5, %c0_6] : memref<8x32xf32, #tpu.memory_space<vmem>>, vector<8x32xf32>
    %cst_7 = arith.constant dense<0.000000e+00> : vector<8x32xf32>
    %5 = tpu.matmul %3, %4, %cst_7 {dimension_numbers = #tpu.dot_dimension_numbers<[1], [0], [0], [1], [0, 0, 1, 1], [], []>} : vector<8x8xf32>, vector<8x32xf32>, vector<8x32xf32> -> vector<8x32xf32>
    %6 = arith.addf %2, %5 : vector<8x32xf32>
    %c0_8 = arith.constant 0 : index
    %c0_9 = arith.constant 0 : index
    %7 = vector.load %arg5[%c0_8, %c0_9] : memref<1x32xf32, #tpu.memory_space<vmem>>, vector<1x32xf32>
    %8 = vector.broadcast %7 : vector<1x32xf32> to vector<8x32xf32>
    %9 = arith.addf %6, %8 : vector<8x32xf32>
    %cst_10 = arith.constant 0.000000e+00 : f32
    %10 = vector.broadcast %cst_10 : f32 to vector<8x32xf32>
    %11 = arith.maximumf %9, %10 : vector<8x32xf32>
    %c0_11 = arith.constant 0 : index
    %c0_12 = arith.constant 0 : index
    %12 = vector.load %arg6[%c0_11, %c0_12] : memref<32x32xf32, #tpu.memory_space<vmem>>, vector<32x32xf32>
    %cst_13 = arith.constant dense<0.000000e+00> : vector<8x32xf32>
    %13 = tpu.matmul %11, %12, %cst_13 {dimension_numbers = #tpu.dot_dimension_numbers<[1], [0], [0], [1], [0, 0, 1, 1], [], []>} : vector<8x32xf32>, vector<32x32xf32>, vector<8x32xf32> -> vector<8x32xf32>
    %c0_14 = arith.constant 0 : index
    %c0_15 = arith.constant 0 : index
    %14 = vector.load %arg7[%c0_14, %c0_15] : memref<1x32xf32, #tpu.memory_space<vmem>>, vector<1x32xf32>
    %15 = vector.broadcast %14 : vector<1x32xf32> to vector<8x32xf32>
    %16 = arith.addf %13, %15 : vector<8x32xf32>
    %cst_16 = arith.constant 0.000000e+00 : f32
    %17 = vector.broadcast %cst_16 : f32 to vector<8x32xf32>
    %18 = arith.maximumf %16, %17 : vector<8x32xf32>
    %c0_17 = arith.constant 0 : index
    %c0_18 = arith.constant 0 : index
    %19 = vector.load %arg8[%c0_17, %c0_18] : memref<32x128xf32, #tpu.memory_space<vmem>>, vector<32x128xf32>
    %cst_19 = arith.constant dense<0.000000e+00> : vector<8x128xf32>
    %20 = tpu.matmul %18, %19, %cst_19 {dimension_numbers = #tpu.dot_dimension_numbers<[1], [0], [0], [1], [0, 0, 1, 1], [], []>} : vector<8x32xf32>, vector<32x128xf32>, vector<8x128xf32> -> vector<8x128xf32>
    %c0_20 = arith.constant 0 : index
    %c0_21 = arith.constant 0 : index
    %21 = vector.load %arg9[%c0_20, %c0_21] : memref<1x128xf32, #tpu.memory_space<vmem>>, vector<1x128xf32>
    %22 = vector.broadcast %21 : vector<1x128xf32> to vector<8x128xf32>
    %23 = arith.addf %20, %22 : vector<8x128xf32>
    %c0_22 = arith.constant 0 : index
    %c0_23 = arith.constant 0 : index
    %24 = vector.load %arg10[%c0_22, %c0_23] : memref<8x128xf32, #tpu.memory_space<vmem>>, vector<8x128xf32>
    tpu.vector_store %arg10[%c0_22, %c0_23], %23 {strides = array<i32>} : memref<8x128xf32, #tpu.memory_space<vmem>>, vector<8x128xf32>,
    return
  }
  func.func @transform_0(%arg0: i32) -> (i32, i32) {
    %c0_i32 = arith.constant 0 : i32
    %c0_i32_0 = arith.constant 0 : i32
    return %arg0, %c0_i32 : i32, i32
  }
  func.func @transform_1(%arg0: i32) -> (i32, i32) {
    %c0_i32 = arith.constant 0 : i32
    %c0_i32_0 = arith.constant 0 : i32
    return %arg0, %c0_i32 : i32, i32
  }
  func.func @transform_2(%arg0: i32) -> (i32, i32) {
    %c0_i32 = arith.constant 0 : i32
    %c0_i32_0 = arith.constant 0 : i32
    %c0_i32_1 = arith.constant 0 : i32
    return %c0_i32, %c0_i32_0 : i32, i32
  }
  func.func @transform_3(%arg0: i32) -> (i32, i32) {
    %c0_i32 = arith.constant 0 : i32
    %c0_i32_0 = arith.constant 0 : i32
    %c0_i32_1 = arith.constant 0 : i32
    return %c0_i32, %c0_i32_0 : i32, i32
  }
  func.func @transform_4(%arg0: i32) -> (i32, i32) {
    %c0_i32 = arith.constant 0 : i32
    %c0_i32_0 = arith.constant 0 : i32
    %c0_i32_1 = arith.constant 0 : i32
    return %c0_i32, %c0_i32_0 : i32, i32
  }
  func.func @transform_5(%arg0: i32) -> (i32, i32) {
    %c0_i32 = arith.constant 0 : i32
    %c0_i32_0 = arith.constant 0 : i32
    %c0_i32_1 = arith.constant 0 : i32
    return %c0_i32, %c0_i32_0 : i32, i32
  }
  func.func @transform_6(%arg0: i32) -> (i32, i32) {
    %c0_i32 = arith.constant 0 : i32
    %c0_i32_0 = arith.constant 0 : i32
    %c0_i32_1 = arith.constant 0 : i32
    return %c0_i32, %c0_i32_0 : i32, i32
  }
  func.func @transform_7(%arg0: i32) -> (i32, i32) {
    %c0_i32 = arith.constant 0 : i32
    %c0_i32_0 = arith.constant 0 : i32
    %c0_i32_1 = arith.constant 0 : i32
    return %c0_i32, %c0_i32_0 : i32, i32
  }
  func.func @transform_8(%arg0: i32) -> (i32, i32) {
    %c0_i32 = arith.constant 0 : i32
    %c0_i32_0 = arith.constant 0 : i32
    %c0_i32_1 = arith.constant 0 : i32
    return %c0_i32, %c0_i32_0 : i32, i32
  }
  func.func @transform_9(%arg0: i32) -> (i32, i32) {
    %c0_i32 = arith.constant 0 : i32
    %c0_i32_0 = arith.constant 0 : i32
    return %arg0, %c0_i32 : i32, i32
  }
}

</mosaic_0001>

<bundles_post_ra>
// kernel: tpu_custom_call.1
= control target key start
LH: loop header
LB: loop body
LE: loop exit
PB: predicated region body
PF: predicated region fallthrough
CT: control target
= control target key end

     0   :  { %14 = vsyncpa [#allocation3], 0  ;;  %s827_s0 = inlined_call_operand.hbm [shape: f32[8,16], index: 0, kind: input, shape index: {}]   ;;  %s828_s1 = inlined_call_operand.hbm [shape: f32[8,8], index: 1, kind: input, shape index: {}]   ;;  %s829_s2 = inlined_call_operand.hbm [shape: f32[16,32], index: 2, kind: input, shape index: {}]   ;;  %s830_s3 = inlined_call_operand.vmem [shape: f32[8,32], index: 3, kind: input, shape index: {}]   ;;  %s831_s4 = inlined_call_operand.vmem [shape: f32[1,32], index: 4, kind: input, shape index: {}]   ;;  %s832_s5 = inlined_call_operand.hbm [shape: f32[32,32], index: 5, kind: input, shape index: {}]   ;;  %s833_s6 = inlined_call_operand.vmem [shape: f32[1,32], index: 6, kind: input, shape index: {}]   ;;  %s834_s7 = inlined_call_operand.hbm [shape: f32[32,128], index: 7, kind: input, shape index: {}]   ;;  %s835_s8 = inlined_call_operand.vmem [shape: f32[1,128], index: 8, kind: input, shape index: {}]   ;;  %s836_s9 = inlined_call_operand.hbm [shape: f32[8,128], index: 9, kind: output, shape index: {}]  }
   0x1   :  { %15 = vsyncpa [#allocation6], 0 }
   0x2   :  { %16 = vsyncpa [#allocation9], 0 }
   0x3   :  { %17 = vsyncpa [#allocation4], 0  ;;  %s669_s30 = smov [#allocation5]   ;;  %s529_s13 = scalar_lea.hbm %s828_s1, 128 }
   0x4   :  { %s34_s10 = sshll.u32 %s669_s30, 4  ;;  %p530_p0 = scmp.ne.s32.totalorder %s828_s1, %s529_s13  ;;  %s35_s10 = int_to_ptr.vmem [resolvable:$true] %s34_s10 }
   0x5   :  { %p533_p1 = scmp.lt.u32.totalorder %s529_s13, %s828_s1 }
   0x7   :  { %p535_p2 = pnand %p533_p1, %p530_p0 }
   0x9   :  { %538 = shalt.err (!%p535_p2)
}
   0xa   :  { %s539_s18 = scalar_lea.vmem %s35_s10, 128  ;;  %p544_p4 = scmp.lt.s32.totalorder %s35_s10, %s35_s10 }
   0xb   :  { %p540_p3 = scmp.ne.s32.totalorder %s35_s10, %s539_s18  ;;  %p545_p5 = scmp.lt.s32.totalorder %s539_s18, %s539_s18 }
   0xd   :  { %p546_p6 = por %p545_p5, %p544_p4 }
   0xf   :  { %p547_p7 = pnand %p546_p6, %p540_p3 }
  0x11   :  { %550 = shalt.err (!%p547_p7)
}
  0x12   :  { %37 = dma.hbm_to_vmem [thread:$0]  %s828_s1, 128, %s35_s10, [#allocation6]  }
  0x13   :  { %s670_s21 = smov [#allocation8]   ;;  %s671_s23 = smov [#allocation2]  }
  0x14   :  { %s59_s22 = sshll.u32 %s670_s21, 4  ;;  %s24_s24 = sshll.u32 %s671_s23, 4  ;;  %s60_s22 = int_to_ptr.vmem [resolvable:$true] %s59_s22  ;;  %s25_s24 = int_to_ptr.vmem [resolvable:$true] %s24_s24 }
  0x15   :  { %s551_s27 = scalar_lea.hbm %s832_s5, 512 }
  0x16   :  { %p552_p8 = scmp.ne.s32.totalorder %s832_s5, %s551_s27  ;;  %p555_p9 = scmp.lt.u32.totalorder %s551_s27, %s832_s5 }
  0x18   :  { %p557_p10 = pnand %p555_p9, %p552_p8 }
  0x1a   :  { %560 = shalt.err (!%p557_p10)
}
  0x1b   :  { %s561_s1 = scalar_lea.vmem %s60_s22, 512  ;;  %p566_p12 = scmp.lt.s32.totalorder %s60_s22, %s60_s22 }
  0x1c   :  { %p562_p11 = scmp.ne.s32.totalorder %s60_s22, %s561_s1  ;;  %p567_p13 = scmp.lt.s32.totalorder %s561_s1, %s561_s1 }
  0x1e   :  { %p568_p0 = por %p567_p13, %p566_p12 }
  0x20   :  { %p569_p1 = pnand %p568_p0, %p562_p11 }
  0x22   :  { %572 = shalt.err (!%p569_p1)
}
  0x23   :  { %s672_s10 = smov 128   ;;  %s673_s12 = smov 8  }
  0x24   :  { %65 = dma.hbm_to_vmem [thread:$0]  %s832_s5, 512, %s60_s22, [#allocation9], %s672_s10, %s672_s10, %s673_s12  }
  0x25   :  { %s573_s17 = scalar_lea.hbm %s827_s0, 128 }
  0x26   :  { %p574_p2 = scmp.ne.s32.totalorder %s827_s0, %s573_s17  ;;  %p577_p3 = scmp.lt.u32.totalorder %s573_s17, %s827_s0 }
  0x28   :  { %p579_p4 = pnand %p577_p3, %p574_p2 }
  0x2a   :  { %582 = shalt.err (!%p579_p4)
}
  0x2b   :  { %s583_s23 = scalar_lea.vmem %s25_s24, 128  ;;  %p588_p6 = scmp.lt.s32.totalorder %s25_s24, %s25_s24 }
  0x2c   :  { %p584_p5 = scmp.ne.s32.totalorder %s25_s24, %s583_s23  ;;  %p589_p7 = scmp.lt.s32.totalorder %s583_s23, %s583_s23 }
  0x2e   :  { %p590_p8 = por %p589_p7, %p588_p6 }
  0x30   :  { %p591_p9 = pnand %p590_p8, %p584_p5 }
  0x32   :  { %594 = shalt.err (!%p591_p9)
}
  0x33   :  { %27 = dma.hbm_to_vmem [thread:$0]  %s827_s0, 128, %s25_s24, [#allocation3]  }
  0x34   :  { %s674_s25 = smov [#allocation7]   ;;  %s675_s27 = smov [#allocation10]  }
  0x35   :  { %s43_s26 = sshll.u32 %s674_s25, 4  ;;  %s73_s28 = sshll.u32 %s675_s27, 4  ;;  %s44_s26 = int_to_ptr.vmem [resolvable:$true] %s43_s26  ;;  %s74_s28 = int_to_ptr.vmem [resolvable:$true] %s73_s28 }
  0x36   :  { %s595_s11 = scalar_lea.hbm %s829_s2, 256 }
  0x37   :  { %p596_p10 = scmp.ne.s32.totalorder %s829_s2, %s595_s11  ;;  %p599_p11 = scmp.lt.u32.totalorder %s595_s11, %s829_s2 }
  0x39   :  { %p601_p12 = pnand %p599_p11, %p596_p10 }
  0x3b   :  { %604 = shalt.err (!%p601_p12)
}
  0x3c   :  { %s605_s0 = scalar_lea.vmem %s44_s26, 256  ;;  %p610_p0 = scmp.lt.s32.totalorder %s44_s26, %s44_s26 }
  0x3d   :  { %p606_p13 = scmp.ne.s32.totalorder %s44_s26, %s605_s0  ;;  %p611_p1 = scmp.lt.s32.totalorder %s605_s0, %s605_s0 }
  0x3f   :  { %p612_p2 = por %p611_p1, %p610_p0 }
  0x41   :  { %p613_p3 = pnand %p612_p2, %p606_p13 }
  0x43   :  { %616 = shalt.err (!%p613_p3)
}
  0x44   :  { %49 = dma.hbm_to_vmem [thread:$0]  %s829_s2, 256, %s44_s26, [#allocation6], %s672_s10, %s672_s10, %s673_s12  }
  0x45   :  { %s617_s19 = scalar_lea.hbm %s834_s7, 512 }
  0x46   :  { %p618_p4 = scmp.ne.s32.totalorder %s834_s7, %s617_s19  ;;  %p621_p5 = scmp.lt.u32.totalorder %s617_s19, %s834_s7 }
  0x48   :  { %p623_p6 = pnand %p621_p5, %p618_p4 }
  0x4a   :  { %626 = shalt.err (!%p623_p6)
}
  0x4b   :  { %s627_s22 = scalar_lea.vmem %s74_s28, 512  ;;  %p632_p8 = scmp.lt.s32.totalorder %s74_s28, %s74_s28 }
  0x4c   :  { %p628_p7 = scmp.ne.s32.totalorder %s74_s28, %s627_s22  ;;  %p633_p9 = scmp.lt.s32.totalorder %s627_s22, %s627_s22 }
  0x4e   :  { %p634_p10 = por %p633_p9, %p632_p8 }
  0x50   :  { %p635_p11 = pnand %p634_p10, %p628_p7 }
  0x52   :  { %638 = shalt.err (!%p635_p11)
}
  0x53   :  { %79 = dma.hbm_to_vmem [thread:$0]  %s834_s7, 512, %s74_s28, [#allocation9], %s672_s10, %s672_s10, %s673_s12  }
  0x54   :  { %661 = dma.done.wait [#allocation3], 128  }
  0x55   :  { %662 = vsyncadd [#allocation3], 4294967168 }
  0x56   :  { %663 = dma.done.wait [#allocation6], 384  }
  0x57   :  { %664 = vsyncadd [#allocation6], 4294966912 }
  0x58   :  { %665 = dma.done.wait [#allocation9], 1024  }
  0x59   :  { %666 = vsyncadd [#allocation9], 4294966272  ;;  %v676_v0 = vmov 0.0|0.0   ;;  %v677_v1 = vmov 0.0   ;;  %vm678_vm0 = vmmov 0   ;;  %vm102_vm1 = vcmask 64512  }
  0x5a   :  { %503 = vmatprep.subr.bf16.mxu1 %v676_v0  ;;  %469 = vmatprep.subr.mxu0 %v677_v1  ;;  %v98_v2 = vld [vmem:[#allocation7] sm:$0xff]  ;;  %v99_v3 = vld [vmem:[#allocation7 + $0x8] sm:$0xff]  ;;  %v101_v4 = vld [vmem:[%s830_s3] sm:$0xff]  ;;  %vm176_vm2 = vcmask 130048   ;;  %vm270_vm3 = vcmask 261120   ;;  %s679_s29 = smov [#allocation11]  }
  0x5b   :  { %471 = vmatprep.mubr.msk.f32.mxu0 %vm678_vm0, %v677_v1  ;;  %478 = vmatprep.mubr.msk.f32.mxu1 %vm678_vm0, %v677_v1  ;;  %v504_v5 = vpack.c.bf16 %v99_v3, %v98_v2  ;;  %v100_v6 = vld [vmem:[#allocation5] sm:$0xff]  ;;  %v97_v7 = vld [vmem:[#allocation2] sm:$0xff]  ;;  %v261_v11 = vld [vmem:[#allocation8 + $0x10] sm:$0xff]  ;;  %s436_s30 = sshll.u32 %s679_s29, 4  ;;  %s437_s30 = int_to_ptr.vmem [resolvable:$true] %s436_s30 }
  0x5c   :  { %470 = vmatpush3.msra.mxu0 %v101_v4  ;;  %v259_v8 = vld [vmem:[#allocation8] sm:$0xff]  ;;  %v260_v9 = vld [vmem:[#allocation8 + $0x8] sm:$0xff]  ;;  %v262_v12 = vld [vmem:[#allocation8 + $0x18] sm:$0xff]  ;;  %s639_s11 = scalar_lea.vmem %s437_s30, 128  ;;  %p644_p13 = scmp.lt.s32.totalorder %s437_s30, %s437_s30 }
  0x5d   :  { %472 = vmatmul.mubr.msk.f32.vlgmr.msra.gmra.mrb[0].mxu0 %vm102_vm1, %v100_v6  ;;  %506 = vmatprep.subr.bf16.mxu0 %v676_v0  ;;  %v507_v10 = vpack.c.bf16 %v260_v9, %v259_v8  ;;  %v510_v13 = vpack.c.bf16 %v262_v12, %v261_v11  ;;  %v345_v14 = vld [vmem:[#allocation10] sm:$0xff]  ;;  %v346_v15 = vld [vmem:[#allocation10 + $0x8] sm:$0xff]  ;;  %v347_v25 = vld [vmem:[#allocation10 + $0x10] sm:$0xff]  ;;  %p640_p12 = scmp.ne.s32.totalorder %s437_s30, %s639_s11  ;;  %p645_p0 = scmp.lt.s32.totalorder %s639_s11, %s639_s11 }
  0x5e   :  { %505 = vmatpush3.bf16.msra.mxu1 %v504_v5  ;;  %489 = vmatprep.mubr.msk.f32.mxu0 %vm678_vm0, %v677_v1  ;;  %v513_v16 = vpack.c.bf16 %v346_v15, %v345_v14  ;;  %v449_v20 = vld [vmem:[%s831_s4] ss:$0 sm:$0xff]  ;;  %v348_v26 = vld [vmem:[#allocation10 + $0x18] sm:$0xff] }
  0x5f   :  { %512 = vmatprep.subr.bf16.mxu1 %v676_v0  ;;  %508 = vmatpush3.bf16.msra.mxu0 %v507_v10  ;;  %v516_v27 = vpack.c.bf16 %v348_v26, %v347_v25  ;;  %v450_v28 = vld [vmem:[%s833_s6] ss:$0 sm:$0xff]  ;;  %p646_p1 = por %p645_p0, %p644_p13 }
  0x60   :  { %509 = vmatprep.subr.bf16.mxu0 %v676_v0  ;;  %v452_v33 = vld [vmem:[%s835_s8] ss:$0 sm:$0xff] }
  0x61   :  { %479 = vmatmul.mubr.msk.f32.vlgmr.msra.gmra.mrb[0].mxu1 %vm176_vm2, %v97_v7  ;;  %p647_p2 = pnand %p646_p1, %p640_p12 }
  0x62   :  { %500 = vmatprep.mubr.msk.f32.mxu1 %vm678_vm0, %v677_v1  ;;  %514 = vmatpush3.bf16.msra.mxu1 %v513_v16 }
  0x63   :  { %511 = vmatpush3.bf16.msra.mxu0 %v510_v13  ;;  %515 = vmatprep.subr.bf16.mxu1 %v676_v0 }
  0x66   :  { %517 = vmatpush3.bf16.msra.mxu1 %v516_v27 }
 0x130   :  { %v172_v17 = vpop.f32.mrb[0].mxu0 }
 0x131   :  { %v473_v18 = vpop.f32.mrb[1].mxu0 }
 0x134   :  { %v246_v19 = vpop.f32.mrb[0].mxu1 }
 0x135   :  { %v247_v21 = vadd.f32 %v246_v19, %v172_v17  ;;  %v480_v22 = vpop.f32.mrb[1].mxu1 }
 0x137   :  { %v257_v23 = vadd.f32 %v449_v20, %v247_v21 }
 0x139   :  { %v258_v24 = vmax.f32 %v257_v23, 0.0 }
 0x13b   :  { %490 = vmatmul.mubr.msk.f32.vlgmr.msra.gmra.mrb[2].mxu0 %vm270_vm3, %v258_v24 }
 0x20e   :  { %v340_v29 = vpop.f32.mrb[2].mxu0 }
 0x20f   :  { %v341_v30 = vadd.f32 %v450_v28, %v340_v29  ;;  %v491_v31 = vpop.f32.mrb[3].mxu0 }
 0x211   :  { %v344_v32 = vmax.f32 %v341_v30, 0.0 }
 0x213   :  { %501 = vmatmul.mubr.msk.f32.vlgmr.msra.gmra.mrb[2].mxu1 %vm270_vm3, %v344_v32 }
 0x2e6   :  { %v425_v34 = vpop.f32.mrb[2].mxu1 }
 0x2e7   :  { %v426_v35 = vadd.f32 %v452_v33, %v425_v34  ;;  %v502_v36 = vpop.f32.mrb[3].mxu1 }
 0x2e9   :  { %429 = vst [vmem:[#allocation11] sm:$0xff] %v426_v35 }
 0x2ea   :  { %650 = shalt.err (!%p647_p2)
}
 0x2eb   :  { %s651_s13 = scalar_lea.hbm %s836_s9, 128 }
 0x2ec   :  { %p652_p3 = scmp.ne.s32.totalorder %s836_s9, %s651_s13  ;;  %p655_p4 = scmp.lt.u32.totalorder %s651_s13, %s836_s9 }
 0x2ee   :  { %p657_p5 = pnand %p655_p4, %p652_p3 }
 0x2f0   :  { %660 = shalt.err (!%p657_p5)
}
 0x2f1   :  { %439 = dma.vmem_to_hbm [thread:$0]  %s437_s30, 128, %s836_s9, [#allocation4]  }
 0x2f2   :  { %667 = dma.done.wait [#allocation4], 128  }
 0x2f3   :  { %668 = vsyncadd [#allocation4], 4294967168 }
 0x2f4   :  { %443 = vsyncpa [#allocation3], 1 }
 0x2f5   :  { %444 = vsyncpa [#allocation6], 1 }
 0x2f6   :  { %445 = vsyncpa [#allocation9], 1 }
 0x2f7   :  { %446 = vsyncpa [#allocation4], 1 }

</bundles_post_ra>
